<compile_context>
chip_gen: v7x
topology: tpu7x:2x2x1
jax: 0.10.0
libtpu: 0.0.40
codegen_flags: <defaults>
</compile_context>

<pallas_src>
import jax
import jax.numpy as jnp
from jax.experimental import pallas as pl
from jax.experimental.pallas import tpu as pltpu


def _pick_nb(n, channel_counts):
    """Smallest batch-block Nb dividing N whose per-operand row counts are
    8-sublane aligned; otherwise the full batch (full-extent blocks are
    always legal regardless of alignment)."""
    for nb in range(1, n + 1):
        if n % nb == 0 and all((nb * c) % 8 == 0 for c in channel_counts):
            return nb
    return n


def _pick_tile_hw(hw, bytes_per_lane, vmem_budget=16 * 1024 * 1024):
    """Largest lane-dense tile that divides H*W and keeps the double-buffered
    VMEM footprint under `vmem_budget` (safe on v5e/v6e/v7x defaults)."""
    for cand in (65536, 32768, 16384, 8192, 4096, 2048, 1024, 512, 256, 128):
        if hw >= cand and hw % cand == 0 and cand * bytes_per_lane <= vmem_budget:
            return cand
    return hw  # full-extent block is always legal


def reduce_cat(x_nchw, w1, b1, w2, b2, t_nchw, *, tile_hw=None, nb=None):
    """ReduceCat(conv1x1, conv1x1, const_tensor, dim=1) forward."""
    N, C, H, W = x_nchw.shape
    C1 = w1.shape[1]
    C2 = w2.shape[1]
    C3 = t_nchw.shape[1]
    C12 = C1 + C2
    Cout = C12 + C3
    HW = H * W
    itemsize = jnp.dtype(x_nchw.dtype).itemsize

    if nb is None:
        nb = _pick_nb(N, (C, C3, Cout))
    assert N % nb == 0, (N, nb)

    if tile_hw is None:
        # Double-buffered bytes per lane of tile (x + t inputs, out output).
        bytes_per_lane = 2 * nb * (C + C3 + Cout) * itemsize
        tile_hw = _pick_tile_hw(HW, bytes_per_lane)
        # v7x megacore: expose >=2 parallel grid steps when the single-step
        # spatial tile stays comfortably lane-dense after halving.
        if ((N // nb) * (HW // tile_hw) < 2
                and tile_hw % 256 == 0 and tile_hw // 2 >= 512):
            tile_hw //= 2
    assert HW % tile_hw == 0, (HW, tile_hw)
    assert tile_hw == HW or tile_hw % 128 == 0, tile_hw

    # Free reshapes (no data movement): flatten batch into the sublane axis so
    # the tiny channel counts (4/2/10) are not padded to 8 sublanes, keeping
    # the spatial dim on the 128-lane axis.
    x2 = x_nchw.reshape(N * C, HW)
    t2 = t_nchw.reshape(N * C3, HW)

    # Fuse both conv branches: one (C12, C) weight, one (C12, 1) bias.
    w_fused = jnp.concatenate([w1, w2], axis=1).T.astype(jnp.float32)   # (C12, C)
    b_fused = jnp.concatenate([b1, b2]).reshape(C12, 1).astype(jnp.float32)

    def kernel(x_ref, t_ref, w_ref, b_ref, o_ref):
        # x_ref: (nb*C,    tile_hw)  input rows (batch-major, channels inner)
        # t_ref: (nb*C3,   tile_hw)  constant-tensor branch rows
        # w_ref: (C12, C)            fused 1x1-conv weights (resident, tiny)
        # b_ref: (C12, 1)            fused biases
        # o_ref: (nb*Cout, tile_hw)  output rows
        w = w_ref[...]                                   # (C12, C)
        bias = b_ref[...]                                # (C12, 1)
        for n in range(nb):                              # static unroll (nb small)
            x = x_ref[n * C:(n + 1) * C, :].astype(jnp.float32)   # (C, tile_hw)
            # Unrolled VPU multiply-add over the C input channels — an (8 x 4)
            # contraction on the MXU would be a regression (review item 6).
            acc = w[:, 0:1] * x[0:1, :]                  # (C12,1)*(1,T) -> (C12,T)
            for c in range(1, C):
                acc = acc + w[:, c:c + 1] * x[c:c + 1, :]
            acc = acc + bias                             # lane-broadcast bias
            # Slab writes (no lane-dim concatenate).
            o0 = n * Cout
            o_ref[o0:o0 + C12, :] = acc.astype(o_ref.dtype)
            o_ref[o0 + C12:o0 + Cout, :] = (
                t_ref[n * C3:(n + 1) * C3, :].astype(o_ref.dtype))

    grid = (N // nb, HW // tile_hw)

    # Advisory cost hint: this kernel is pure HBM bandwidth.
    bytes_accessed = (N * (C + C3 + Cout) * HW) * itemsize \
        + (w_fused.size + b_fused.size) * 4
    cost = pl.CostEstimate(flops=2 * N * HW * C12 * C + N * HW * C12,
                           transcendentals=0,
                           bytes_accessed=bytes_accessed)

    out2 = pl.pallas_call(
        kernel,
        out_shape=jax.ShapeDtypeStruct((N * Cout, HW), x_nchw.dtype),
        grid_spec=pl.GridSpec(
            grid=grid,
            in_specs=[
                pl.BlockSpec((nb * C, tile_hw), lambda b, s: (b, s)),    # x rows
                pl.BlockSpec((nb * C3, tile_hw), lambda b, s: (b, s)),   # const rows
                pl.BlockSpec((C12, C), lambda b, s: (0, 0)),             # fused W
                pl.BlockSpec((C12, 1), lambda b, s: (0, 0)),             # fused b
            ],
            out_specs=pl.BlockSpec((nb * Cout, tile_hw), lambda b, s: (b, s)),
        ),
        compiler_params=pltpu.CompilerParams(
            dimension_semantics=("parallel", "parallel")),
        cost_estimate=cost,
    )(x2, t2, w_fused, b_fused)

    # Rows are already (n, cout)-ordered; un-flatten the spatial dim (free).
    return out2.reshape(N, Cout, H, W)


def _reference(x_nchw, w1, b1, w2, b2, t_nchw):
    xf = x_nchw.astype(jnp.float32)
    y1 = jnp.einsum("nchw,co->nohw", xf, w1) + b1[None, :, None, None]
    y2 = jnp.einsum("nchw,co->nohw", xf, w2) + b2[None, :, None, None]
    return jnp.concatenate(
        [y1, y2, t_nchw.astype(jnp.float32)], axis=1).astype(x_nchw.dtype)


if __name__ == "__main__":
    key = jax.random.PRNGKey(0)
    k_x, k_w1, k_b1, k_w2, k_b2, k_t = jax.random.split(key, 6)

    N, C, H, W = 2, 4, 16, 16
    C1, C2, C3 = 4, 4, 2

    x = jax.random.normal(k_x, (N, C, H, W), dtype=jnp.float32)
    # 1x1 conv == matmul weights [C, Cout]
    w1 = jax.random.normal(k_w1, (C, C1), dtype=jnp.float32) * 0.1
    b1 = jax.random.normal(k_b1, (C1,), dtype=jnp.float32) * 0.1
    w2 = jax.random.normal(k_w2, (C, C2), dtype=jnp.float32) * 0.1
    b2 = jax.random.normal(k_b2, (C2,), dtype=jnp.float32) * 0.1
    # constant-tensor branch (ReduceCat also accepts raw tensors as args)
    t = jax.random.normal(k_t, (N, C3, H, W), dtype=jnp.float32)

    out = jax.block_until_ready(reduce_cat(x, w1, b1, w2, b2, t))
    ref = _reference(x, w1, b1, w2, b2, t)

    assert out.shape == (N, C1 + C2 + C3, H, W), out.shape
    assert jnp.allclose(out, ref, atol=1e-5, rtol=1e-5), "mismatch vs reference"
    print("KERNEL_OK")
</pallas_src>

<mosaic_0001>
module attributes {stable_mosaic.version = 11 : i64} {
  func.func @kernel(%arg0: i32, %arg1: i32, %arg2: memref<8x256xf32, #tpu.memory_space<vmem>>, %arg3: memref<4x256xf32, #tpu.memory_space<vmem>>, %arg4: memref<8x4xf32, #tpu.memory_space<vmem>>, %arg5: memref<8x1xf32, #tpu.memory_space<vmem>>, %arg6: memref<20x256xf32, #tpu.memory_space<vmem>>) attributes {dimension_semantics = [#tpu.dimension_semantics<parallel>, #tpu.dimension_semantics<parallel>], iteration_bounds = array<i64: 1, 1>, scalar_prefetch = 0 : i64, scratch_operands = 0 : i64, tpu.core_type = #tpu.core_type<tc>, window_params = [{transform_indices = @transform_0, window_bounds = array<i64: 8, 256>}, {transform_indices = @transform_1, window_bounds = array<i64: 4, 256>}, {pipeline_mode = #tpu.pipeline_mode<synchronous>, transform_indices = @transform_2, window_bounds = array<i64: 8, 4>}, {pipeline_mode = #tpu.pipeline_mode<synchronous>, transform_indices = @transform_3, window_bounds = array<i64: 8, 1>}, {transform_indices = @transform_4, window_bounds = array<i64: 20, 256>}]} {
    %c0 = arith.constant 0 : index
    %c0_0 = arith.constant 0 : index
    %0 = vector.load %arg4[%c0, %c0_0] : memref<8x4xf32, #tpu.memory_space<vmem>>, vector<8x4xf32>
    %c0_1 = arith.constant 0 : index
    %c0_2 = arith.constant 0 : index
    %1 = vector.load %arg5[%c0_1, %c0_2] : memref<8x1xf32, #tpu.memory_space<vmem>>, vector<8x1xf32>
    %c0_3 = arith.constant 0 : index
    %c0_4 = arith.constant 0 : index
    %2 = vector.load %arg2[%c0_3, %c0_4] : memref<8x256xf32, #tpu.memory_space<vmem>>, vector<4x256xf32>
    %3 = vector.extract_strided_slice %0 {offsets = [0, 0], sizes = [8, 1], strides = [1, 1]} : vector<8x4xf32> to vector<8x1xf32>
    %4 = vector.extract_strided_slice %2 {offsets = [0, 0], sizes = [1, 256], strides = [1, 1]} : vector<4x256xf32> to vector<1x256xf32>
    %5 = vector.broadcast %3 : vector<8x1xf32> to vector<8x256xf32>
    %6 = vector.broadcast %4 : vector<1x256xf32> to vector<8x256xf32>
    %7 = arith.mulf %5, %6 : vector<8x256xf32>
    %8 = vector.extract_strided_slice %0 {offsets = [0, 1], sizes = [8, 1], strides = [1, 1]} : vector<8x4xf32> to vector<8x1xf32>
    %9 = vector.extract_strided_slice %2 {offsets = [1, 0], sizes = [1, 256], strides = [1, 1]} : vector<4x256xf32> to vector<1x256xf32>
    %10 = vector.broadcast %8 : vector<8x1xf32> to vector<8x256xf32>
    %11 = vector.broadcast %9 : vector<1x256xf32> to vector<8x256xf32>
    %12 = arith.mulf %10, %11 : vector<8x256xf32>
    %13 = arith.addf %7, %12 : vector<8x256xf32>
    %14 = vector.extract_strided_slice %0 {offsets = [0, 2], sizes = [8, 1], strides = [1, 1]} : vector<8x4xf32> to vector<8x1xf32>
    %15 = vector.extract_strided_slice %2 {offsets = [2, 0], sizes = [1, 256], strides = [1, 1]} : vector<4x256xf32> to vector<1x256xf32>
    %16 = vector.broadcast %14 : vector<8x1xf32> to vector<8x256xf32>
    %17 = vector.broadcast %15 : vector<1x256xf32> to vector<8x256xf32>
    %18 = arith.mulf %16, %17 : vector<8x256xf32>
    %19 = arith.addf %13, %18 : vector<8x256xf32>
    %20 = vector.extract_strided_slice %0 {offsets = [0, 3], sizes = [8, 1], strides = [1, 1]} : vector<8x4xf32> to vector<8x1xf32>
    %21 = vector.extract_strided_slice %2 {offsets = [3, 0], sizes = [1, 256], strides = [1, 1]} : vector<4x256xf32> to vector<1x256xf32>
    %22 = vector.broadcast %20 : vector<8x1xf32> to vector<8x256xf32>
    %23 = vector.broadcast %21 : vector<1x256xf32> to vector<8x256xf32>
    %24 = arith.mulf %22, %23 : vector<8x256xf32>
    %25 = arith.addf %19, %24 : vector<8x256xf32>
    %26 = vector.broadcast %1 : vector<8x1xf32> to vector<8x256xf32>
    %27 = arith.addf %25, %26 : vector<8x256xf32>
    %c0_5 = arith.constant 0 : index
    %c0_6 = arith.constant 0 : index
    %28 = vector.load %arg6[%c0_5, %c0_6] : memref<20x256xf32, #tpu.memory_space<vmem>>, vector<8x256xf32>
    tpu.vector_store %arg6[%c0_5, %c0_6], %27 {strides = array<i32>} : memref<20x256xf32, #tpu.memory_space<vmem>>, vector<8x256xf32>,
    %c0_7 = arith.constant 0 : index
    %c0_8 = arith.constant 0 : index
    %29 = vector.load %arg3[%c0_7, %c0_8] : memref<4x256xf32, #tpu.memory_space<vmem>>, vector<2x256xf32>
    %c8 = arith.constant 8 : index
    %c0_9 = arith.constant 0 : index
    %30 = vector.load %arg6[%c8, %c0_9] : memref<20x256xf32, #tpu.memory_space<vmem>>, vector<2x256xf32>
    tpu.vector_store %arg6[%c8, %c0_9], %29 {strides = array<i32>} : memref<20x256xf32, #tpu.memory_space<vmem>>, vector<2x256xf32>,
    %c4 = arith.constant 4 : index
    %c0_10 = arith.constant 0 : index
    %31 = vector.load %arg2[%c4, %c0_10] : memref<8x256xf32, #tpu.memory_space<vmem>>, vector<4x256xf32>
    %32 = vector.extract_strided_slice %0 {offsets = [0, 0], sizes = [8, 1], strides = [1, 1]} : vector<8x4xf32> to vector<8x1xf32>
    %33 = vector.extract_strided_slice %31 {offsets = [0, 0], sizes = [1, 256], strides = [1, 1]} : vector<4x256xf32> to vector<1x256xf32>
    %34 = vector.broadcast %32 : vector<8x1xf32> to vector<8x256xf32>
    %35 = vector.broadcast %33 : vector<1x256xf32> to vector<8x256xf32>
    %36 = arith.mulf %34, %35 : vector<8x256xf32>
    %37 = vector.extract_strided_slice %0 {offsets = [0, 1], sizes = [8, 1], strides = [1, 1]} : vector<8x4xf32> to vector<8x1xf32>
    %38 = vector.extract_strided_slice %31 {offsets = [1, 0], sizes = [1, 256], strides = [1, 1]} : vector<4x256xf32> to vector<1x256xf32>
    %39 = vector.broadcast %37 : vector<8x1xf32> to vector<8x256xf32>
    %40 = vector.broadcast %38 : vector<1x256xf32> to vector<8x256xf32>
    %41 = arith.mulf %39, %40 : vector<8x256xf32>
    %42 = arith.addf %36, %41 : vector<8x256xf32>
    %43 = vector.extract_strided_slice %0 {offsets = [0, 2], sizes = [8, 1], strides = [1, 1]} : vector<8x4xf32> to vector<8x1xf32>
    %44 = vector.extract_strided_slice %31 {offsets = [2, 0], sizes = [1, 256], strides = [1, 1]} : vector<4x256xf32> to vector<1x256xf32>
    %45 = vector.broadcast %43 : vector<8x1xf32> to vector<8x256xf32>
    %46 = vector.broadcast %44 : vector<1x256xf32> to vector<8x256xf32>
    %47 = arith.mulf %45, %46 : vector<8x256xf32>
    %48 = arith.addf %42, %47 : vector<8x256xf32>
    %49 = vector.extract_strided_slice %0 {offsets = [0, 3], sizes = [8, 1], strides = [1, 1]} : vector<8x4xf32> to vector<8x1xf32>
    %50 = vector.extract_strided_slice %31 {offsets = [3, 0], sizes = [1, 256], strides = [1, 1]} : vector<4x256xf32> to vector<1x256xf32>
    %51 = vector.broadcast %49 : vector<8x1xf32> to vector<8x256xf32>
    %52 = vector.broadcast %50 : vector<1x256xf32> to vector<8x256xf32>
    %53 = arith.mulf %51, %52 : vector<8x256xf32>
    %54 = arith.addf %48, %53 : vector<8x256xf32>
    %55 = vector.broadcast %1 : vector<8x1xf32> to vector<8x256xf32>
    %56 = arith.addf %54, %55 : vector<8x256xf32>
    %c10 = arith.constant 10 : index
    %c0_11 = arith.constant 0 : index
    %57 = vector.load %arg6[%c10, %c0_11] : memref<20x256xf32, #tpu.memory_space<vmem>>, vector<8x256xf32>
    tpu.vector_store %arg6[%c10, %c0_11], %56 {strides = array<i32>} : memref<20x256xf32, #tpu.memory_space<vmem>>, vector<8x256xf32>,
    %c2 = arith.constant 2 : index
    %c0_12 = arith.constant 0 : index
    %58 = vector.load %arg3[%c2, %c0_12] : memref<4x256xf32, #tpu.memory_space<vmem>>, vector<2x256xf32>
    %c18 = arith.constant 18 : index
    %c0_13 = arith.constant 0 : index
    %59 = vector.load %arg6[%c18, %c0_13] : memref<20x256xf32, #tpu.memory_space<vmem>>, vector<2x256xf32>
    tpu.vector_store %arg6[%c18, %c0_13], %58 {strides = array<i32>} : memref<20x256xf32, #tpu.memory_space<vmem>>, vector<2x256xf32>,
    return
  }
  func.func @transform_0(%arg0: i32, %arg1: i32) -> (i32, i32) {
    %c0_i32 = arith.constant 0 : i32
    return %arg0, %arg1 : i32, i32
  }
  func.func @transform_1(%arg0: i32, %arg1: i32) -> (i32, i32) {
    %c0_i32 = arith.constant 0 : i32
    return %arg0, %arg1 : i32, i32
  }
  func.func @transform_2(%arg0: i32, %arg1: i32) -> (i32, i32) {
    %c0_i32 = arith.constant 0 : i32
    %c0_i32_0 = arith.constant 0 : i32
    %c0_i32_1 = arith.constant 0 : i32
    return %c0_i32, %c0_i32_0 : i32, i32
  }
  func.func @transform_3(%arg0: i32, %arg1: i32) -> (i32, i32) {
    %c0_i32 = arith.constant 0 : i32
    %c0_i32_0 = arith.constant 0 : i32
    %c0_i32_1 = arith.constant 0 : i32
    return %c0_i32, %c0_i32_0 : i32, i32
  }
  func.func @transform_4(%arg0: i32, %arg1: i32) -> (i32, i32) {
    %c0_i32 = arith.constant 0 : i32
    return %arg0, %arg1 : i32, i32
  }
}

</mosaic_0001>

<bundles_post_ra>
// kernel: tpu_custom_call.1
= control target key start
LH: loop header
LB: loop body
LE: loop exit
PB: predicated region body
PF: predicated region fallthrough
CT: control target
= control target key end

     0   :  { %v221_v1 = vmov 0   ;;  %v222_v2 = vmov 2   ;;  %s289_s0 = inlined_call_operand.vmem [shape: f32[8,256], index: 0, kind: input, shape index: {}]   ;;  %s290_s1 = inlined_call_operand.vmem [shape: f32[4,256], index: 1, kind: input, shape index: {}]   ;;  %s291_s2 = inlined_call_operand.vmem [shape: f32[8,4], index: 2, kind: input, shape index: {}]   ;;  %s292_s3 = inlined_call_operand.vmem [shape: f32[8,1], index: 3, kind: input, shape index: {}]   ;;  %s293_s4 = inlined_call_operand.hbm [shape: f32[20,256], index: 4, kind: output, shape index: {}]  }
   0x1   :  { %v18_v0 = vld [vmem:[%s291_s2] sm:$0xff]  ;;  %189 = vset.pattern.permute.xlu0 %v221_v1  ;;  %191 = vset.pattern.permute.xlu1 %v222_v2 }
   0x2   :  { %24 = vperm.xlu0 %189, %v18_v0   ;;  %54 = vperm.xlu1 %191, %v18_v0  }
   0x3   :  { %9 = vsyncpa [#allocation3], 0  ;;  %v223_v3 = vmov 1   ;;  %v224_v4 = vmov 3   ;;  %v19_v5 = vld [vmem:[%s292_s3] sm:$0xff]  ;;  %v27_v10 = vlaneseq }
   0x4   :  { %v94_v6 = vld [vmem:[%s290_s1] sm:$0x33]  ;;  %v160_v7 = vld [vmem:[%s290_s1] sm:$0xcc]  ;;  %v21_v13 = vld [vmem:[%s289_s0 + $0x8] sm:$0xf] }
   0x5   :  { %v96_v8 = vcombine.high %v94_v6, %v94_v6  ;;  %98 = vst [vmem:[#allocation2 + $0x10] sm:$0x3] %v94_v6  ;;  %v162_v9 = vcombine.high %v160_v7, %v160_v7  ;;  %164 = vst [vmem:[#allocation2 + $0x20] sm:$0xc] %v160_v7  ;;  %v28_v11 = vshrl.u32 %v27_v10, 7 }
   0x6   :  { %190 = vset.pattern.permute.xlu0 %v223_v3  ;;  %192 = vset.pattern.permute.xlu1 %v224_v4  ;;  %v20_v12 = vld [vmem:[%s289_s0] sm:$0xf]  ;;  %v100_v16 = vld [vmem:[%s289_s0] sm:$0xf0]  ;;  %v101_v17 = vld [vmem:[%s289_s0 + $0x8] sm:$0xf0] }
   0x7   :  { %38 = vperm.xlu0 %190, %v18_v0   ;;  %70 = vperm.xlu1 %192, %v18_v0   ;;  %99 = vst [vmem:[#allocation2 + $0x18] sm:$0x3] %v96_v8  ;;  %165 = vst [vmem:[#allocation2 + $0x28] sm:$0xc] %v162_v9  ;;  %v29_v14 = vsub.s32 0, %v28_v11  ;;  %v104_v15 = vsub.s32 4, %v28_v11 }
   0x8   :  { %v59_v18 = vsub.s32 2, %v28_v11  ;;  %v126_v19 = vsub.s32 6, %v28_v11  ;;  %v43_v20 = vsub.s32 1, %v28_v11  ;;  %v114_v21 = vsub.s32 5, %v28_v11  ;;  %s225_s0 = smov [#allocation2]  }
   0x9   :  { %v75_v22 = vsub.s32 3, %v28_v11  ;;  %v138_v23 = vsub.s32 7, %v28_v11  ;;  %v30_v24 = vrot.slane %v20_v12, %v29_v14  ;;  %v34_v25 = vrot.slane %v21_v13, %v29_v14  ;;  %s171_s28 = sshll.u32 %s225_s0, 4  ;;  %s172_s28 = int_to_ptr.vmem [resolvable:$true] %s171_s28 }
   0xa   :  { %v105_v26 = vrot.slane %v100_v16, %v104_v15  ;;  %v109_v27 = vrot.slane %v101_v17, %v104_v15  ;;  %v60_v30 = vrot.slane %v20_v12, %v59_v18  ;;  %v64_v31 = vrot.slane %v21_v13, %v59_v18  ;;  %s197_s29 = scalar_lea.vmem %s172_s28, 768  ;;  %p202_p1 = scmp.lt.s32.totalorder %s172_s28, %s172_s28 }
   0xb   :  { %193 = vset.pattern.permute.xlu1 %v221_v1  ;;  %194 = vset.pattern.permute.xlu0 %v221_v1  ;;  %v127_v32 = vrot.slane %v100_v16, %v126_v19  ;;  %v131_v33 = vrot.slane %v101_v17, %v126_v19  ;;  %v44_v34 = vrot.slane %v20_v12, %v43_v20  ;;  %p198_p0 = scmp.ne.s32.totalorder %s172_s28, %s197_s29  ;;  %p203_p2 = scmp.lt.s32.totalorder %s197_s29, %s197_s29 }
   0xc   :  { %87 = vperm.xlu1 %193, %v19_v5   ;;  %v48_v35 = vrot.slane %v21_v13, %v43_v20  ;;  %v115_v36 = vrot.slane %v100_v16, %v114_v21  ;;  %v119_v37 = vrot.slane %v101_v17, %v114_v21  ;;  %v76_v38 = vrot.slane %v20_v12, %v75_v22 }
   0xd   :  { %v80_v39 = vrot.slane %v21_v13, %v75_v22  ;;  %v139_v40 = vrot.slane %v100_v16, %v138_v23  ;;  %v143_v41 = vrot.slane %v101_v17, %v138_v23  ;;  %p204_p3 = por %p203_p2, %p202_p1 }
   0xf   :  { %p205_p4 = pnand %p204_p3, %p198_p0 }
  0x81   :  { %v25_v28 = vpop.permute.xlu0 %24  ;;  %v55_v29 = vpop.permute.xlu1 %54 }
  0x82   :  { %v35_v42 = vmul.f32 %v30_v24, %v25_v28  ;;  %v36_v43 = vmul.f32 %v34_v25, %v25_v28  ;;  %v110_v44 = vmul.f32 %v105_v26, %v25_v28  ;;  %v111_v45 = vmul.f32 %v109_v27, %v25_v28 }
  0x83   :  { %v65_v46 = vmul.f32 %v60_v30, %v55_v29  ;;  %v66_v47 = vmul.f32 %v64_v31, %v55_v29  ;;  %v132_v48 = vmul.f32 %v127_v32, %v55_v29  ;;  %v133_v49 = vmul.f32 %v131_v33, %v55_v29 }
  0x86   :  { %v39_v50 = vpop.permute.xlu0 %38  ;;  %v71_v51 = vpop.permute.xlu1 %70 }
  0x87   :  { %v49_v52 = vmul.f32 %v44_v34, %v39_v50  ;;  %v50_v53 = vmul.f32 %v48_v35, %v39_v50  ;;  %v120_v54 = vmul.f32 %v115_v36, %v39_v50  ;;  %v121_v55 = vmul.f32 %v119_v37, %v39_v50 }
  0x88   :  { %v81_v56 = vmul.f32 %v76_v38, %v71_v51  ;;  %v82_v57 = vmul.f32 %v80_v39, %v71_v51  ;;  %v144_v58 = vmul.f32 %v139_v40, %v71_v51  ;;  %v145_v59 = vmul.f32 %v143_v41, %v71_v51 }
  0x89   :  { %v51_v60 = vadd.f32 %v49_v52, %v35_v42  ;;  %v52_v61 = vadd.f32 %v50_v53, %v36_v43  ;;  %v122_v62 = vadd.f32 %v120_v54, %v110_v44  ;;  %v123_v63 = vadd.f32 %v121_v55, %v111_v45 }
  0x8b   :  { %v67_v0 = vadd.f32 %v65_v46, %v51_v60  ;;  %v68_v1 = vadd.f32 %v66_v47, %v52_v61  ;;  %v134_v2 = vadd.f32 %v132_v48, %v122_v62  ;;  %v135_v3 = vadd.f32 %v133_v49, %v123_v63  ;;  %v88_v4 = vpop.permute.xlu1 %87 }
  0x8d   :  { %v83_v5 = vadd.f32 %v81_v56, %v67_v0  ;;  %v84_v6 = vadd.f32 %v82_v57, %v68_v1  ;;  %v146_v7 = vadd.f32 %v144_v58, %v134_v2  ;;  %v147_v8 = vadd.f32 %v145_v59, %v135_v3 }
  0x8f   :  { %v90_v9 = vadd.f32 %v88_v4, %v83_v5  ;;  %v91_v10 = vadd.f32 %v88_v4, %v84_v6  ;;  %v148_v11 = vadd.f32 %v146_v7, %v88_v4  ;;  %v149_v12 = vadd.f32 %v147_v8, %v88_v4 }
  0x91   :  { %92 = vst [vmem:[#allocation2] sm:$0xff] %v90_v9  ;;  %93 = vst [vmem:[#allocation2 + $0x8] sm:$0xff] %v91_v10  ;;  %v152_v13 = vrot.slane %v148_v11, 6  ;;  %v153_v14 = vrot.slane %v149_v12, 6 }
  0x93   :  { %156 = vst [vmem:[#allocation2 + $0x10] sm:$0xfc] %v152_v13  ;;  %157 = vst [vmem:[#allocation2 + $0x18] sm:$0xfc] %v153_v14 }
  0x94   :  { %158 = vst [vmem:[#allocation2 + $0x20] sm:$0x3] %v152_v13  ;;  %159 = vst [vmem:[#allocation2 + $0x28] sm:$0x3] %v153_v14 }
  0x95   :  { %208 = shalt.err (!%p205_p4)
}
  0x96   :  { %s209_s6 = scalar_lea.hbm %s293_s4, 768 }
  0x97   :  { %p210_p5 = scmp.ne.s32.totalorder %s293_s4, %s209_s6  ;;  %p213_p6 = scmp.lt.u32.totalorder %s209_s6, %s293_s4 }
  0x99   :  { %p215_p7 = pnand %p213_p6, %p210_p5 }
  0x9b   :  { %218 = shalt.err (!%p215_p7)
}
  0x9c   :  { %s226_s11 = smov 256   ;;  %s227_s12 = smov 16  }
  0x9d   :  { %177 = dma.vmem_to_hbm [thread:$0]  %s172_s28, 768, %s293_s4, [#allocation3], %s226_s11, %s226_s11, %s227_s12  }
  0x9e   :  { %219 = dma.done.wait [#allocation3], 768  }
  0x9f   :  { %220 = vsyncadd [#allocation3], 4294966528 }
  0xa0   :  { %181 = vsyncpa [#allocation3], 1 }

</bundles_post_ra>
